<compile_context>
chip_gen: v5e
topology: v5e:2x2
jax: 0.10.0
libtpu: 0.0.40
codegen_flags: <defaults>
</compile_context>

<pallas_src>
import functools

import jax
import jax.numpy as jnp
import numpy as np
from jax.experimental import pallas as pl
from jax.experimental.pallas import tpu as pltpu


def _round_up(x, m):
    return ((x + m - 1) // m) * m


def _global_encoder_kernel(x_ref, w_ref, b_ref, lo_ref, hi_ref, out_ref, acc_ref,
                           *, n_rows, tiles_per_split):
    """One (core-split, segment-block, node-tile) grid step.

    x_ref:   (TN, E)    node-feature tile (input dtype; cast to bf16 for the MXU).
    w_ref:   (E, E)     W^T in bf16.
    b_ref:   (1, E)     bias in f32.
    lo_ref:  (TS, 1)    per-segment CSR lower bounds (int32).
    hi_ref:  (TS, 1)    per-segment CSR upper bounds (int32).
    out_ref: (1, TS, E) partial-sum output block for this core split.
    acc_ref: (TS, E)    f32 VMEM accumulator (persists across node tiles).
    """
    c = pl.program_id(0)      # core split     (parallel)
    i = pl.program_id(2)      # node tile      (reduction axis, last -> "arbitrary")
    tn = x_ref.shape[0]
    ts = acc_ref.shape[0]

    @pl.when(i == 0)
    def _():
        acc_ref[...] = jnp.zeros_like(acc_ref)

    # mlp = Linear(E, E) + LeakyReLU(0.2): bf16 MXU matmul, f32 accumulate/epilogue.
    xb = x_ref[...].astype(jnp.bfloat16)
    y = jnp.dot(xb, w_ref[...], preferred_element_type=jnp.float32)
    y = y + b_ref[...]
    y = jnp.maximum(y, jnp.float32(0.2) * y)          # LeakyReLU(0.2), single VALU op

    # Global row ids for this tile (this split's slice of the node range).
    row0 = (c * tiles_per_split + i) * tn
    rows = jax.lax.broadcasted_iota(jnp.int32, (tn, 1), 0) + row0
    # Zero rows past the real node count: partial-tile OOB data must not reach the
    # MXU contraction (0 * NaN = NaN), so masking P alone would not be enough.
    y = jnp.where(rows < n_rows, y, jnp.float32(0.0))

    # segment_csr selector via interval mask (constant cost, no O(S) serial chain),
    # built directly in the matmul input dtype.
    col = jax.lax.broadcasted_iota(jnp.int32, (ts, tn), 1) + row0
    p = ((col >= lo_ref[...]) & (col < hi_ref[...])).astype(jnp.bfloat16)

    # segment_csr as a single MXU contraction over rows: (TS, TN) @ (TN, E).
    acc_ref[...] += jnp.dot(p, y.astype(jnp.bfloat16),
                            preferred_element_type=jnp.float32)

    @pl.when(i == pl.num_programs(2) - 1)
    def _():
        out_ref[...] = acc_ref[...][None, :, :]


def global_encoder_forward(h_dag, w_t, bias, obs_ptr=None, *,
                           node_tile=2048, seg_tile=512, core_splits=2):
    """Equivalent of GlobalEncoder.forward.

    h_dag:   (N, E) node embeddings (f32 or bf16; bf16 halves streamed HBM bytes).
    w_t:     (E, E) transpose of the nn.Linear weight.
    bias:    (E,)   bias.
    obs_ptr: optional (S+1,) int32 CSR pointers; None -> sum over all rows.
    Returns: (S, E) float32   (S = 1 when obs_ptr is None).
    """
    n, e = h_dag.shape
    if obs_ptr is None:
        obs_ptr = jnp.array([0, n], dtype=jnp.int32)
    obs_ptr = jnp.asarray(obs_ptr).astype(jnp.int32)
    num_segments = int(obs_ptr.shape[0]) - 1          # static at trace time

    # ---- tiling ---------------------------------------------------------------
    tn = _round_up(min(node_tile, _round_up(n, 8)), 8)
    n_tiles = pl.cdiv(n, tn)
    splits = max(1, min(core_splits, n_tiles))        # node-range split across TCs
    tiles_per_split = pl.cdiv(n_tiles, splits)

    if num_segments <= seg_tile:
        ts, s_blocks = num_segments, 1                # common path: one segment block
    else:
        ts = _round_up(seg_tile, 8)
        s_blocks = pl.cdiv(num_segments, ts)
    s_pad = ts * s_blocks

    # ---- small operands (cast once; x itself is streamed untouched) ------------
    w = w_t.astype(jnp.bfloat16)                      # (E, E) = W^T
    b = bias.astype(jnp.float32).reshape(1, e)
    lower = obs_ptr[:num_segments]
    upper = obs_ptr[1:num_segments + 1]
    if s_pad > num_segments:                          # padded segments are empty
        pad = s_pad - num_segments
        lower = jnp.concatenate([lower, jnp.zeros((pad,), jnp.int32)])
        upper = jnp.concatenate([upper, jnp.zeros((pad,), jnp.int32)])
    lower = lower.reshape(s_pad, 1)
    upper = upper.reshape(s_pad, 1)

    # ---- index maps -------------------------------------------------------------
    def x_map(c, sb, i):
        t = c * tiles_per_split + i
        if splits * tiles_per_split > n_tiles:        # static Python condition
            t = jnp.minimum(t, n_tiles - 1)           # clamp; rows get masked anyway
        return (t, 0)

    # ---- VMEM budget (v7x has 64 MiB physical VMEM; stay well under) ------------
    xbytes = h_dag.dtype.itemsize
    est = (2 * tn * e * xbytes          # double-buffered x tile
           + 2 * e * e * 2              # W (bf16)
           + 2 * e * 4 + 4 * ts * 4     # bias + lo/hi
           + 2 * ts * e * 4             # output block (double-buffered)
           + ts * e * 4                 # accumulator
           + 4 * tn * e * 4)            # in-kernel y / selector temporaries
    vmem_limit = int(min(max(4 * est, 8 << 20), 32 << 20))

    out = pl.pallas_call(
        functools.partial(_global_encoder_kernel, n_rows=n,
                          tiles_per_split=tiles_per_split),
        out_shape=jax.ShapeDtypeStruct((splits, s_pad, e), jnp.float32),
        grid=(splits, s_blocks, tiles_per_split),
        in_specs=[
            pl.BlockSpec((tn, e), x_map),
            pl.BlockSpec((e, e), lambda c, sb, i: (0, 0)),
            pl.BlockSpec((1, e), lambda c, sb, i: (0, 0)),
            pl.BlockSpec((ts, 1), lambda c, sb, i: (sb, 0)),
            pl.BlockSpec((ts, 1), lambda c, sb, i: (sb, 0)),
        ],
        out_specs=pl.BlockSpec((1, ts, e), lambda c, sb, i: (c, sb, 0)),
        scratch_shapes=[pltpu.VMEM((ts, e), jnp.float32)],
        compiler_params=pltpu.CompilerParams(
            dimension_semantics=("parallel", "parallel", "arbitrary"),
            vmem_limit_bytes=vmem_limit,
        ),
    )(h_dag, w, b, lower, upper)

    out = out.sum(axis=0) if splits > 1 else out[0]   # reduce per-TC partial sums
    return out[:num_segments]


def _reference(h_dag, w_t, bias, obs_ptr=None):
    y = h_dag @ w_t + bias[None, :]
    y = jnp.where(y >= 0, y, 0.2 * y)
    if obs_ptr is None:
        return jnp.sum(y, axis=0, keepdims=True)
    ptr = np.asarray(obs_ptr)
    segs = [jnp.sum(y[int(ptr[s]):int(ptr[s + 1])], axis=0) for s in range(len(ptr) - 1)]
    return jnp.stack(segs, axis=0)


if __name__ == "__main__":
    embed_dim = 32
    hidden_dim = 64   # unused by forward (mirrors the PyTorch __init__ signature)
    num_nodes = 16

    key = jax.random.PRNGKey(0)
    k_x, k_w, k_b = jax.random.split(key, 3)

    # Deterministic "PyTorch-like" init: U(-1/sqrt(E), 1/sqrt(E))
    bound = 1.0 / np.sqrt(embed_dim)
    W = jax.random.uniform(k_w, (embed_dim, embed_dim), jnp.float32, -bound, bound)
    b = jax.random.uniform(k_b, (embed_dim,), jnp.float32, -bound, bound)
    w_t = W.T
    h_dag = jax.random.normal(k_x, (num_nodes, embed_dim), jnp.float32)

    rtol, atol = 3e-2, 5e-2   # bf16 MXU inputs, f32 accumulation

    # Path 1: obs_ptr=None -> (1, E) global sum.
    out_none = jax.block_until_ready(global_encoder_forward(h_dag, w_t, b, obs_ptr=None))
    ref_none = _reference(h_dag, w_t, b, obs_ptr=None)
    np.testing.assert_allclose(np.asarray(out_none), np.asarray(ref_none),
                               rtol=rtol, atol=atol)

    # Path 2: segment_csr with obs_ptr -> (S, E).
    obs_ptr = jnp.array([0, 5, 9, 16], dtype=jnp.int32)
    out_seg = jax.block_until_ready(global_encoder_forward(h_dag, w_t, b, obs_ptr=obs_ptr))
    ref_seg = _reference(h_dag, w_t, b, obs_ptr=obs_ptr)
    np.testing.assert_allclose(np.asarray(out_seg), np.asarray(ref_seg),
                               rtol=rtol, atol=atol)

    # Path 3: multiple node tiles split across the 2-way "parallel" core axis
    # (a segment straddles the split boundary -> exercises the partial-sum reduce).
    out_split = jax.block_until_ready(
        global_encoder_forward(h_dag, w_t, b, obs_ptr=obs_ptr, node_tile=8, core_splits=2))
    np.testing.assert_allclose(np.asarray(out_split), np.asarray(ref_seg),
                               rtol=rtol, atol=atol)

    # Path 4: multiple node tiles on a single split (exercises the VMEM accumulator
    # across the reduction grid axis).
    out_tiled = jax.block_until_ready(
        global_encoder_forward(h_dag, w_t, b, obs_ptr=obs_ptr, node_tile=8, core_splits=1))
    np.testing.assert_allclose(np.asarray(out_tiled), np.asarray(ref_seg),
                               rtol=rtol, atol=atol)

    print("KERNEL_OK")
</pallas_src>

<mosaic_0001>
module attributes {stable_mosaic.version = 11 : i64} {
  func.func @_global_encoder_kernel(%arg0: i32, %arg1: i32, %arg2: i32, %arg3: memref<16x32xf32, #tpu.memory_space<vmem>>, %arg4: memref<32x32xbf16, #tpu.memory_space<vmem>>, %arg5: memref<1x32xf32, #tpu.memory_space<vmem>>, %arg6: memref<1x1xi32, #tpu.memory_space<vmem>>, %arg7: memref<1x1xi32, #tpu.memory_space<vmem>>, %arg8: memref<1x1x32xf32, #tpu.memory_space<vmem>>, %arg9: memref<1x32xf32, #tpu.memory_space<vmem>>) attributes {dimension_semantics = [#tpu.dimension_semantics<parallel>, #tpu.dimension_semantics<parallel>, #tpu.dimension_semantics<arbitrary>], iteration_bounds = array<i64: 1, 1, 1>, scalar_prefetch = 0 : i64, scratch_operands = 1 : i64, tpu.core_type = #tpu.core_type<tc>, window_params = [{transform_indices = @transform_0, window_bounds = array<i64: 16, 32>}, {pipeline_mode = #tpu.pipeline_mode<synchronous>, transform_indices = @transform_1, window_bounds = array<i64: 32, 32>}, {pipeline_mode = #tpu.pipeline_mode<synchronous>, transform_indices = @transform_2, window_bounds = array<i64: 1, 32>}, {transform_indices = @transform_3, window_bounds = array<i64: 1, 1>}, {transform_indices = @transform_4, window_bounds = array<i64: 1, 1>}, {transform_indices = @transform_5, window_bounds = array<i64: 1, 1, 32>}]} {
    %c0_i32 = arith.constant 0 : i32
    %0 = arith.cmpi eq, %arg2, %c0_i32 : i32
    %1 = arith.extui %0 : i1 to i32
    %c0_i32_0 = arith.constant 0 : i32
    %2 = arith.cmpi ne, %1, %c0_i32_0 : i32
    scf.if %2 {
      %cst_20 = arith.constant 0.000000e+00 : f32
      %46 = vector.broadcast %cst_20 : f32 to vector<1x32xf32>
      %c0_21 = arith.constant 0 : index
      %c0_22 = arith.constant 0 : index
      %47 = vector.load %arg9[%c0_21, %c0_22] : memref<1x32xf32, #tpu.memory_space<vmem>>, vector<1x32xf32>
      tpu.vector_store %arg9[%c0_21, %c0_22], %46 {strides = array<i32>} : memref<1x32xf32, #tpu.memory_space<vmem>>, vector<1x32xf32>,
    } else {
    }
    %c0 = arith.constant 0 : index
    %c0_1 = arith.constant 0 : index
    %3 = vector.load %arg3[%c0, %c0_1] : memref<16x32xf32, #tpu.memory_space<vmem>>, vector<16x32xf32>
    %4 = arith.truncf %3 : vector<16x32xf32> to vector<16x32xbf16>
    %c0_2 = arith.constant 0 : index
    %c0_3 = arith.constant 0 : index
    %5 = vector.load %arg4[%c0_2, %c0_3] : memref<32x32xbf16, #tpu.memory_space<vmem>>, vector<32x32xbf16>
    %cst = arith.constant dense<0.000000e+00> : vector<16x32xf32>
    %6 = tpu.matmul %4, %5, %cst {dimension_numbers = #tpu.dot_dimension_numbers<[1], [0], [0], [1], [0, 0, 1, 1], [], []>} : vector<16x32xbf16>, vector<32x32xbf16>, vector<16x32xf32> -> vector<16x32xf32>
    %c0_4 = arith.constant 0 : index
    %c0_5 = arith.constant 0 : index
    %7 = vector.load %arg5[%c0_4, %c0_5] : memref<1x32xf32, #tpu.memory_space<vmem>>, vector<1x32xf32>
    %8 = vector.broadcast %7 : vector<1x32xf32> to vector<16x32xf32>
    %9 = arith.addf %6, %8 : vector<16x32xf32>
    %cst_6 = arith.constant 2.000000e-01 : f32
    %10 = vector.broadcast %cst_6 : f32 to vector<16x32xf32>
    %11 = arith.mulf %10, %9 : vector<16x32xf32>
    %12 = arith.maximumf %9, %11 : vector<16x32xf32>
    %c1_i32 = arith.constant 1 : i32
    %13 = arith.muli %arg0, %c1_i32 : i32
    %14 = arith.addi %13, %arg2 : i32
    %c16_i32 = arith.constant 16 : i32
    %15 = arith.muli %14, %c16_i32 : i32
    %16 = tpu.iota {dimensions = array<i32: 0>} : vector<16x1xi32>
    %17 = vector.broadcast %15 : i32 to vector<16x1xi32>
    %18 = arith.addi %16, %17 : vector<16x1xi32>
    %c16_i32_7 = arith.constant 16 : i32
    %19 = vector.broadcast %c16_i32_7 : i32 to vector<16x1xi32>
    %20 = arith.cmpi slt, %18, %19 : vector<16x1xi32>
    %cst_8 = arith.constant 0.000000e+00 : f32
    %21 = vector.shape_cast %20 : vector<16x1xi1> to vector<16x1xi1>
    %22 = vector.broadcast %21 : vector<16x1xi1> to vector<16x32xi1>
    %23 = vector.broadcast %cst_8 : f32 to vector<16x32xf32>
    %24 = arith.select %22, %12, %23 : vector<16x32xi1>, vector<16x32xf32>
    %25 = tpu.iota {dimensions = array<i32: 1>} : vector<1x16xi32>
    %26 = vector.broadcast %15 : i32 to vector<1x16xi32>
    %27 = arith.addi %25, %26 : vector<1x16xi32>
    %c0_9 = arith.constant 0 : index
    %c0_10 = arith.constant 0 : index
    %28 = vector.load %arg6[%c0_9, %c0_10] : memref<1x1xi32, #tpu.memory_space<vmem>>, vector<1x1xi32>
    %29 = vector.broadcast %28 : vector<1x1xi32> to vector<1x16xi32>
    %30 = arith.cmpi sge, %27, %29 : vector<1x16xi32>
    %c0_11 = arith.constant 0 : index
    %c0_12 = arith.constant 0 : index
    %31 = vector.load %arg7[%c0_11, %c0_12] : memref<1x1xi32, #tpu.memory_space<vmem>>, vector<1x1xi32>
    %32 = vector.broadcast %31 : vector<1x1xi32> to vector<1x16xi32>
    %33 = arith.cmpi slt, %27, %32 : vector<1x16xi32>
    %34 = arith.andi %30, %33 : vector<1x16xi1>
    %35 = arith.extui %34 : vector<1x16xi1> to vector<1x16xi32>
    %36 = arith.sitofp %35 : vector<1x16xi32> to vector<1x16xf32>
    %37 = arith.truncf %36 : vector<1x16xf32> to vector<1x16xbf16>
    %c0_13 = arith.constant 0 : index
    %c0_14 = arith.constant 0 : index
    %38 = vector.load %arg9[%c0_13, %c0_14] : memref<1x32xf32, #tpu.memory_space<vmem>>, vector<1x32xf32>
    %39 = arith.truncf %24 : vector<16x32xf32> to vector<16x32xbf16>
    %cst_15 = arith.constant dense<0.000000e+00> : vector<1x32xf32>
    %40 = tpu.matmul %37, %39, %cst_15 {dimension_numbers = #tpu.dot_dimension_numbers<[1], [0], [0], [1], [0, 0, 1, 1], [], []>} : vector<1x16xbf16>, vector<16x32xbf16>, vector<1x32xf32> -> vector<1x32xf32>
    %41 = arith.addf %38, %40 : vector<1x32xf32>
    %c0_16 = arith.constant 0 : index
    %c0_17 = arith.constant 0 : index
    %42 = vector.load %arg9[%c0_16, %c0_17] : memref<1x32xf32, #tpu.memory_space<vmem>>, vector<1x32xf32>
    tpu.vector_store %arg9[%c0_16, %c0_17], %41 {strides = array<i32>} : memref<1x32xf32, #tpu.memory_space<vmem>>, vector<1x32xf32>,
    %c0_i32_18 = arith.constant 0 : i32
    %43 = arith.cmpi eq, %arg2, %c0_i32_18 : i32
    %44 = arith.extui %43 : i1 to i32
    %c0_i32_19 = arith.constant 0 : i32
    %45 = arith.cmpi ne, %44, %c0_i32_19 : i32
    scf.if %45 {
      %c0_20 = arith.constant 0 : index
      %c0_21 = arith.constant 0 : index
      %46 = vector.load %arg9[%c0_20, %c0_21] : memref<1x32xf32, #tpu.memory_space<vmem>>, vector<1x32xf32>
      %47 = vector.shape_cast %46 : vector<1x32xf32> to vector<1x1x32xf32>
      %c0_22 = arith.constant 0 : index
      %c0_23 = arith.constant 0 : index
      %c0_24 = arith.constant 0 : index
      %48 = vector.load %arg8[%c0_22, %c0_23, %c0_24] : memref<1x1x32xf32, #tpu.memory_space<vmem>>, vector<1x1x32xf32>
      tpu.vector_store %arg8[%c0_22, %c0_23, %c0_24], %47 {strides = array<i32>} : memref<1x1x32xf32, #tpu.memory_space<vmem>>, vector<1x1x32xf32>,
    } else {
    }
    return
  }
  func.func @transform_0(%arg0: i32, %arg1: i32, %arg2: i32) -> (i32, i32) {
    %c1_i32 = arith.constant 1 : i32
    %0 = arith.muli %arg0, %c1_i32 : i32
    %1 = arith.addi %0, %arg2 : i32
    %c0_i32 = arith.constant 0 : i32
    %c0_i32_0 = arith.constant 0 : i32
    return %1, %c0_i32 : i32, i32
  }
  func.func @transform_1(%arg0: i32, %arg1: i32, %arg2: i32) -> (i32, i32) {
    %c0_i32 = arith.constant 0 : i32
    %c0_i32_0 = arith.constant 0 : i32
    %c0_i32_1 = arith.constant 0 : i32
    return %c0_i32, %c0_i32_0 : i32, i32
  }
  func.func @transform_2(%arg0: i32, %arg1: i32, %arg2: i32) -> (i32, i32) {
    %c0_i32 = arith.constant 0 : i32
    %c0_i32_0 = arith.constant 0 : i32
    %c0_i32_1 = arith.constant 0 : i32
    return %c0_i32, %c0_i32_0 : i32, i32
  }
  func.func @transform_3(%arg0: i32, %arg1: i32, %arg2: i32) -> (i32, i32) {
    %c0_i32 = arith.constant 0 : i32
    %c0_i32_0 = arith.constant 0 : i32
    return %arg1, %c0_i32 : i32, i32
  }
  func.func @transform_4(%arg0: i32, %arg1: i32, %arg2: i32) -> (i32, i32) {
    %c0_i32 = arith.constant 0 : i32
    %c0_i32_0 = arith.constant 0 : i32
    return %arg1, %c0_i32 : i32, i32
  }
  func.func @transform_5(%arg0: i32, %arg1: i32, %arg2: i32) -> (i32, i32, i32) {
    %c0_i32 = arith.constant 0 : i32
    %c0_i32_0 = arith.constant 0 : i32
    return %arg0, %arg1, %c0_i32 : i32, i32, i32
  }
}

</mosaic_0001>

<bundles_post_ra>
// kernel: tpu_custom_call.1
= control target key start
LH: loop header
LB: loop body
LE: loop exit
PB: predicated region body
PF: predicated region fallthrough
CT: control target
= control target key end

     0   :  { %s357_s0 = inlined_call_operand.hbm [shape: f32[16,32], index: 0, kind: input, shape index: {}]   ;;  %s358_s1 = inlined_call_operand.hbm [shape: bf16[32,32], index: 1, kind: input, shape index: {}]   ;;  %s359_s2 = inlined_call_operand.vmem [shape: f32[1,32], index: 2, kind: input, shape index: {}]   ;;  %s360_s3 = inlined_call_operand.<no memory space> [shape: s32[1,1], index: 3, kind: input, shape index: {}]   ;;  %s361_s5 = inlined_call_operand.hbm [shape: f32[1,1,32], index: 5, kind: output, shape index: {}]   ;;  %s362_s4 = inlined_call_operand.<no memory space> [shape: s32[1,1], index: 4, kind: input, shape index: {}]  }
   0x1   :  { %v10_v0 = vstv %s360_s3  ;;  %v12_v1 = vstv %s362_s4 }
   0x2   :  { %11 = vst [vmem:[#allocation3] sm:$0x1] %v10_v0 }
   0x3   :  { %13 = vst [vmem:[#allocation4] sm:$0x1] %v12_v1 }
   0x4   :  { %14 = vsyncpa [#allocation6], 0 }
   0x5   :  { %15 = vsyncpa [#allocation9], 0 }
   0x6   :  { %16 = vsyncpa [#allocation7], 0  ;;  %s25_s24 = sshll.u32 %s357_s0, 4  ;;  %s297_s25 = smov [#allocation5]   ;;  %s26_s24 = int_to_ptr.hbm [resolvable:$true] %s25_s24 }
   0x7   :  { %s27_s26 = sshll.u32 %s297_s25, 4  ;;  %s38_s3 = sshll.u32 %s358_s1, 4  ;;  %s28_s26 = int_to_ptr.vmem [resolvable:$true] %s27_s26  ;;  %s39_s3 = int_to_ptr.hbm [resolvable:$true] %s38_s3 }
   0x8   :  { %s298_s29 = smov 128   ;;  %s299_s30 = smov 8  }
   0x9   :  { %33 = dma.hbm_to_vmem [thread:$0]  %s26_s24, 256, %s28_s26, [#allocation6], %s298_s29, %s298_s29, %s299_s30  }
   0xa   :  { %s300_s4 = smov [#allocation8]   ;;  %s301_s7 = smov 64  }
   0xb   :  { %s40_s6 = sshll.u32 %s300_s4, 4  ;;  %s302_s8 = smov 4   ;;  %s41_s6 = int_to_ptr.vmem [resolvable:$true] %s40_s6 }
   0xc   :  { %46 = dma.hbm_to_vmem [thread:$0]  %s39_s3, 256, %s41_s6, [#allocation9], %s301_s7, %s301_s7, %s302_s8  }
   0xd   :  { %291 = dma.done.wait [#allocation6], 256  }
   0xe   :  { %292 = vsyncadd [#allocation6], 4294967040 }
   0xf   :  { %293 = dma.done.wait [#allocation9], 256  }
  0x10   :  { %294 = vsyncadd [#allocation9], 4294967040  ;;  %v303_v2 = vmov 0   ;;  %v207_v3 = vld [vmem:[#allocation8 + $0x8] sm:$0xff]  ;;  %v206_v4 = vld [vmem:[#allocation8] sm:$0xff]  ;;  %vm93_vm0 = vcmask 261120   ;;  %v131_v13 = vlaneseq }
  0x11   :  { %217 = vset.pattern.permute.xlu0 %v303_v2  ;;  %v134_v5 = vld [vmem:[#allocation3] sm:$0x1]  ;;  %103 = vmatpush.bf16.msra.mxu0 %v207_v3  ;;  %v70_v6 = vld [vmem:[#allocation5] sm:$0xff]  ;;  %v71_v7 = vld [vmem:[#allocation5 + $0x8] sm:$0xff]  ;;  %vm68_vm1 = vcmask 253952   ;;  %v304_v10 = vmov 0.0  }
  0x12   :  { %136 = vperm.xlu0 %217, %v134_v5   ;;  %v72_v8 = vpack.c.bf16 %v71_v7, %v70_v6  ;;  %v140_v9 = vld [vmem:[#allocation4] sm:$0x1]  ;;  %69 = vst.msk [vmem:[#allocation2] sm:$0x1] %vm68_vm1, %v304_v10  ;;  %v218_v14 = vld [vmem:[%s359_s2] ss:$0 sm:$0xff] }
  0x13   :  { %v132_v16 = vand.u32 127, %v131_v13  ;;  %vm152_vm5 = vcmask 130048   ;;  %s305_s2 = smov [#allocation10]   ;;  %s184_s12 = sshll.u32 %s361_s5, 4  ;;  %s185_s12 = int_to_ptr.hbm [resolvable:$true] %s184_s12 }
  0x14   :  { %s182_s9 = sshll.u32 %s305_s2, 4  ;;  %s183_s9 = int_to_ptr.vmem [resolvable:$true] %s182_s9 }
  0x15   :  { %104 = vmatpush.bf16.msra.mxu0 %v206_v4 }
  0x18   :  { %203 = vmatmul.msk.bf16.vlgmr.msra.gmra.mxu0 %vm93_vm0, %v72_v8 }
  0x19   :  { %v150_v29 = vld [vmem:[#allocation2] sm:$0x1] }
  0x1a   :  { %142 = vperm.xlu0 %217, %v140_v9  }
  0x84   :  { %v137_v11 = vpop.permute.xlu0 %136 }
  0x85   :  { %v138_v17 = vperm.slane %v137_v11, 0 }
  0x87   :  { %vm139_vm2 = vcmp.ge.s32.totalorder %v132_v16, %v138_v17 }
  0x8c   :  { %v143_v15 = vpop.permute.xlu0 %142 }
  0x8d   :  { %v144_v19 = vperm.slane %v143_v15, 0 }
  0x8f   :  { %vm145_vm3 = vcmp.lt.s32.totalorder %v132_v16, %v144_v19 }
  0x90   :  { %vm146_vm4 = vmand %vm139_vm2, %vm145_vm3 }
  0x91   :  { %v204_v26 = vsel %vm146_vm4, 1.0, %v304_v10 }
  0x92   :  { %v149_v28 = vpack.c.bf16 %v204_v26, %v204_v26 }
  0x95   :  { %v106_v12 = vpop.f32.mrf.mxu0 }
  0x96   :  { %v107_v18 = vadd.f32 %v218_v14, %v106_v12 }
  0x98   :  { %v111_v21 = vmul.f32 0.2, %v107_v18 }
  0x9a   :  { %v113_v24 = vmax.f32 %v107_v18, %v111_v21 }
  0x9d   :  { %v108_v20 = vpop.f32.mrf.mxu0 }
  0x9e   :  { %v109_v22 = vadd.f32 %v218_v14, %v108_v20 }
  0xa0   :  { %v112_v23 = vmul.f32 0.2, %v109_v22 }
  0xa2   :  { %v114_v25 = vmax.f32 %v109_v22, %v112_v23 }
  0xa4   :  { %v151_v27 = vpack.c.bf16 %v114_v25, %v113_v24 }
  0xa6   :  { %163 = vmatpush.bf16.msra.mxu1 %v151_v27 }
  0xa9   :  { %205 = vmatmul.msk.bf16.vlgmr.msra.gmra.mxu1 %vm152_vm5, %v149_v28 }
 0x126   :  { %v165_v30 = vpop.f32.mrf.mxu1 }
 0x127   :  { %v169_v31 = vadd.f32 %v165_v30, %v150_v29 }
 0x129   :  { %171 = vst.msk [vmem:[#allocation2] sm:$0x1] %vm68_vm1, %v169_v31 }
 0x12e   :  { %v167_v32 = vpop.f32.mrf.mxu1 }
 0x130   :  { %v175_v33 = vld [vmem:[#allocation2] sm:$0x1] }
 0x131   :  { %176 = vst.msk [vmem:[#allocation10] sm:$0x1] %vm68_vm1, %v175_v33 }
 0x132   :  { %187 = dma.vmem_to_hbm [thread:$0]  %s183_s9, 16, %s185_s12, [#allocation7]  }
 0x133   :  { %295 = dma.done.wait [#allocation7], 16  }
 0x134   :  { %296 = vsyncadd [#allocation7], 4294967280 }
 0x135   :  { %192 = vsyncpa [#allocation6], 1 }
 0x136   :  { %193 = vsyncpa [#allocation9], 1 }
 0x137   :  { %194 = vsyncpa [#allocation7], 1 }

</bundles_post_ra>
